<compile_context>
chip_gen: v5e
topology: v5e:2x2
jax: 0.10.0
libtpu: 0.0.40
codegen_flags: <defaults>
</compile_context>

<pallas_src>
import functools

import jax
import jax.numpy as jnp
from jax.experimental import pallas as pl
from jax.experimental.pallas import tpu as pltpu

_LANES = 128
_PAD_LOGIT = -1.0e4   # exp(-1e4) == 0.0 in f32  =>  padded BCE loss is exactly 0


def _round_up(x, m):
    return ((x + m - 1) // m) * m


def _ldam_tile_kernel(scalars_ref, y_pred_ref, y_true_ref, partial_ref):
    """One (block_rows, 128) tile: margined BCE + per-class weight, accumulated
    into a lane-aligned (8, 128) f32 partial-sum output block."""
    t = pl.program_id(1)

    @pl.when(t == 0)
    def _init():
        partial_ref[...] = jnp.zeros_like(partial_ref)

    m0 = scalars_ref[0]      # margin, class 0 (majority)
    m1 = scalars_ref[1]      # margin, class 1 (minority)
    w0 = scalars_ref[2]      # weight, class 0
    w1 = scalars_ref[3]      # weight, class 1

    y = y_true_ref[...].astype(jnp.float32)
    is_pos = y == 1.0
    x = y_pred_ref[...].astype(jnp.float32) - jnp.where(is_pos, m1, m0)

    # binary_cross_entropy_with_logits, reduction='none' (numerically stable)
    loss = jnp.maximum(x, 0.0) - x * y + jnp.log1p(jnp.exp(-jnp.abs(x)))
    loss = loss * jnp.where(is_pos, w1, w0)

    # (block_rows, 128) -> (8, 128): pure vreg adds, no per-tile XLU reduction
    br = loss.shape[0]
    partial_ref[...] += jnp.sum(loss.reshape(br // 8, 8, _LANES), axis=0)


def ldam_loss(y_pred, y_true, *, max_m=0.2, block_rows=1024, num_splits=2):
    """LDAM loss ('balanced' class weights) for 1-D binary y_pred / y_true."""
    y_pred = jnp.ravel(y_pred)
    y_true = jnp.ravel(y_true)
    n = y_pred.shape[0]

    # -------- phase 1 (cheap, hoisted out of the streaming pass) ------------
    minority = jnp.sum(y_true.astype(jnp.float32))        # count of label == 1
    majority = jnp.float32(n) - minority
    degenerate = jnp.logical_or(majority == 0.0, minority == 0.0)
    maj_w = jnp.where(degenerate, 1.0,
                      (n / 2.0) / jnp.where(majority == 0.0, 1.0, majority))
    min_w = jnp.where(degenerate, 1.0,
                      (n / 2.0) / jnp.where(minority == 0.0, 1.0, minority))
    total = maj_w + min_w
    maj_w = maj_w / total
    min_w = min_w / total
    m0 = 1.0 / jnp.sqrt(maj_w)
    m1 = 1.0 / jnp.sqrt(min_w)
    scale = max_m / jnp.maximum(m0, m1)
    m0 = m0 * scale
    m1 = m1 * scale
    scalars = jnp.stack([m0, m1, maj_w, min_w]).astype(jnp.float32)

    # -------- phase 2: lane-dense padded layout + tiled streaming reduction --
    rows_needed = -(-n // _LANES)
    rows_per_split = -(-rows_needed // num_splits)
    br = min(block_rows, _round_up(max(rows_per_split, 1), 16))
    br = _round_up(br, 16)                 # sublane-aligned for f32 and bf16
    tiles_per_split = -(-rows_per_split // br)
    rows_padded = num_splits * tiles_per_split * br
    n_padded = rows_padded * _LANES
    pad = n_padded - n

    yp = jnp.pad(y_pred, (0, pad), constant_values=_PAD_LOGIT)
    yt = jnp.pad(y_true, (0, pad), constant_values=0)
    yp = yp.reshape(rows_padded, _LANES)
    yt = yt.reshape(rows_padded, _LANES)

    bytes_accessed = (n_padded * yp.dtype.itemsize
                      + n_padded * yt.dtype.itemsize
                      + 4 * 4
                      + num_splits * 8 * _LANES * 4)
    cost = pl.CostEstimate(flops=10 * n_padded,
                           transcendentals=2 * n_padded,
                           bytes_accessed=bytes_accessed)

    partials = pl.pallas_call(
        _ldam_tile_kernel,
        out_shape=jax.ShapeDtypeStruct((num_splits * 8, _LANES), jnp.float32),
        grid=(num_splits, tiles_per_split),
        in_specs=[
            pl.BlockSpec(memory_space=pltpu.MemorySpace.SMEM),        # scalars
            pl.BlockSpec((br, _LANES),
                         lambda c, t: (c * tiles_per_split + t, 0)),  # y_pred
            pl.BlockSpec((br, _LANES),
                         lambda c, t: (c * tiles_per_split + t, 0)),  # y_true
        ],
        out_specs=pl.BlockSpec((8, _LANES), lambda c, t: (c, 0)),
        compiler_params=pltpu.CompilerParams(
            dimension_semantics=("parallel", "arbitrary")),
        cost_estimate=cost,
    )(scalars, yp, yt)

    # one cheap final cross-lane reduction (num_splits*8*128 values) + true mean
    return jnp.sum(partials) / jnp.float32(n)


def _reference(y_pred, y_true, max_m=0.2):
    # pure-JAX reference mirroring the PyTorch module (for sanity only)
    y_pred = y_pred.astype(jnp.float32)
    y_true = y_true.astype(jnp.float32)
    n = y_true.size
    minority = jnp.sum(y_true)
    majority = n - minority
    degenerate = jnp.logical_or(majority == 0, minority == 0)
    maj_w = jnp.where(degenerate, 1.0,
                      (1.0 / jnp.where(majority == 0, 1.0, majority)) * (n / 2))
    min_w = jnp.where(degenerate, 1.0,
                      (1.0 / jnp.where(minority == 0, 1.0, minority)) * (n / 2))
    total = maj_w + min_w
    maj_w, min_w = maj_w / total, min_w / total
    m0, m1 = 1.0 / jnp.sqrt(maj_w), 1.0 / jnp.sqrt(min_w)
    s = max_m / jnp.maximum(m0, m1)
    m0, m1 = m0 * s, m1 * s
    x = y_pred - jnp.where(y_true == 1.0, m1, m0)
    loss = jnp.maximum(x, 0.0) - x * y_true + jnp.log1p(jnp.exp(-jnp.abs(x)))
    loss = jnp.where(y_true == 1.0, loss * min_w, loss * maj_w)
    return jnp.mean(loss)


if __name__ == "__main__":
    key = jax.random.PRNGKey(0)
    k1, k2, k3, k4 = jax.random.split(key, 4)

    ldam = jax.jit(functools.partial(ldam_loss, max_m=0.2))

    # 1) lane-aligned batch of binary-classification logits (~25% positives)
    N = 4096
    y_pred = jax.random.normal(k1, (N,), dtype=jnp.float32)
    y_true = (jax.random.uniform(k2, (N,)) < 0.25).astype(jnp.float32)
    out = ldam(y_pred, y_true)
    jax.block_until_ready(out)
    ref = _reference(y_pred, y_true, max_m=0.2)
    assert jnp.allclose(out, ref, rtol=1e-5, atol=1e-6), (out, ref)

    # 2) ragged size + bf16 0/1 labels (padding path + in-kernel upcast)
    N2 = 1000
    y_pred2 = jax.random.normal(k3, (N2,), dtype=jnp.float32)
    y_true2 = (jax.random.uniform(k4, (N2,)) < 0.1).astype(jnp.float32)
    out2 = ldam(y_pred2, y_true2.astype(jnp.bfloat16))
    jax.block_until_ready(out2)
    ref2 = _reference(y_pred2, y_true2, max_m=0.2)
    assert jnp.allclose(out2, ref2, rtol=1e-5, atol=1e-6), (out2, ref2)

    print("KERNEL_OK")
</pallas_src>

<mosaic_0001>
module attributes {stable_mosaic.version = 11 : i64} {
  func.func @_ldam_tile_kernel(%arg0: i32, %arg1: i32, %arg2: memref<4xf32, #tpu.memory_space<smem>>, %arg3: memref<16x128xf32, #tpu.memory_space<vmem>>, %arg4: memref<16x128xf32, #tpu.memory_space<vmem>>, %arg5: memref<8x128xf32, #tpu.memory_space<vmem>>) attributes {dimension_semantics = [#tpu.dimension_semantics<parallel>, #tpu.dimension_semantics<arbitrary>], iteration_bounds = array<i64: 2, 1>, scalar_prefetch = 0 : i64, scratch_operands = 0 : i64, tpu.core_type = #tpu.core_type<tc>, window_params = [{transform_indices = @transform_0, window_bounds = array<i64: 4>}, {transform_indices = @transform_1, window_bounds = array<i64: 16, 128>}, {transform_indices = @transform_2, window_bounds = array<i64: 16, 128>}, {transform_indices = @transform_3, window_bounds = array<i64: 8, 128>}]} {
    %c0_i32 = arith.constant 0 : i32
    %0 = arith.cmpi eq, %arg1, %c0_i32 : i32
    %1 = arith.extui %0 : i1 to i32
    %c0_i32_0 = arith.constant 0 : i32
    %2 = arith.cmpi ne, %1, %c0_i32_0 : i32
    scf.if %2 {
      %cst_12 = arith.constant 0.000000e+00 : f32
      %34 = vector.broadcast %cst_12 : f32 to vector<8x128xf32>
      %c0_13 = arith.constant 0 : index
      %c0_14 = arith.constant 0 : index
      %35 = vector.load %arg5[%c0_13, %c0_14] : memref<8x128xf32, #tpu.memory_space<vmem>>, vector<8x128xf32>
      tpu.vector_store %arg5[%c0_13, %c0_14], %34 {strides = array<i32>} : memref<8x128xf32, #tpu.memory_space<vmem>>, vector<8x128xf32>,
    } else {
    }
    %c0 = arith.constant 0 : index
    %3 = memref.load %arg2[%c0] : memref<4xf32, #tpu.memory_space<smem>>
    %c1 = arith.constant 1 : index
    %4 = memref.load %arg2[%c1] : memref<4xf32, #tpu.memory_space<smem>>
    %c2 = arith.constant 2 : index
    %5 = memref.load %arg2[%c2] : memref<4xf32, #tpu.memory_space<smem>>
    %c3 = arith.constant 3 : index
    %6 = memref.load %arg2[%c3] : memref<4xf32, #tpu.memory_space<smem>>
    %c0_1 = arith.constant 0 : index
    %c0_2 = arith.constant 0 : index
    %7 = vector.load %arg4[%c0_1, %c0_2] : memref<16x128xf32, #tpu.memory_space<vmem>>, vector<16x128xf32>
    %cst = arith.constant 1.000000e+00 : f32
    %8 = vector.broadcast %cst : f32 to vector<16x128xf32>
    %9 = arith.cmpf oeq, %7, %8 : vector<16x128xf32>
    %c0_3 = arith.constant 0 : index
    %c0_4 = arith.constant 0 : index
    %10 = vector.load %arg3[%c0_3, %c0_4] : memref<16x128xf32, #tpu.memory_space<vmem>>, vector<16x128xf32>
    %11 = vector.broadcast %4 : f32 to vector<16x128xf32>
    %12 = vector.broadcast %3 : f32 to vector<16x128xf32>
    %13 = arith.select %9, %11, %12 : vector<16x128xi1>, vector<16x128xf32>
    %14 = arith.subf %10, %13 : vector<16x128xf32>
    %cst_5 = arith.constant 0.000000e+00 : f32
    %15 = vector.broadcast %cst_5 : f32 to vector<16x128xf32>
    %16 = arith.maximumf %14, %15 : vector<16x128xf32>
    %17 = arith.mulf %14, %7 : vector<16x128xf32>
    %18 = arith.subf %16, %17 : vector<16x128xf32>
    %19 = math.absf %14 : vector<16x128xf32>
    %cst_6 = arith.constant 0.000000e+00 : f32
    %20 = vector.broadcast %cst_6 : f32 to vector<16x128xf32>
    %21 = arith.subf %20, %19 : vector<16x128xf32>
    %22 = math.exp %21 : vector<16x128xf32>
    %23 = math.log1p %22 : vector<16x128xf32>
    %24 = arith.addf %18, %23 : vector<16x128xf32>
    %25 = vector.broadcast %6 : f32 to vector<16x128xf32>
    %26 = vector.broadcast %5 : f32 to vector<16x128xf32>
    %27 = arith.select %9, %25, %26 : vector<16x128xi1>, vector<16x128xf32>
    %28 = arith.mulf %24, %27 : vector<16x128xf32>
    %c0_7 = arith.constant 0 : index
    %c0_8 = arith.constant 0 : index
    %29 = vector.load %arg5[%c0_7, %c0_8] : memref<8x128xf32, #tpu.memory_space<vmem>>, vector<8x128xf32>
    %30 = vector.shape_cast %28 : vector<16x128xf32> to vector<2x8x128xf32>
    %cst_9 = arith.constant dense<0.000000e+00> : vector<8x128xf32>
    %31 = vector.multi_reduction <add>, %30, %cst_9 [0] : vector<2x8x128xf32> to vector<8x128xf32>
    %32 = arith.addf %29, %31 : vector<8x128xf32>
    %c0_10 = arith.constant 0 : index
    %c0_11 = arith.constant 0 : index
    %33 = vector.load %arg5[%c0_10, %c0_11] : memref<8x128xf32, #tpu.memory_space<vmem>>, vector<8x128xf32>
    tpu.vector_store %arg5[%c0_10, %c0_11], %32 {strides = array<i32>} : memref<8x128xf32, #tpu.memory_space<vmem>>, vector<8x128xf32>,
    return
  }
  func.func @transform_0(%arg0: i32, %arg1: i32) -> i32 {
    %c0_i32 = arith.constant 0 : i32
    %c0_i32_0 = arith.constant 0 : i32
    return %c0_i32 : i32
  }
  func.func @transform_1(%arg0: i32, %arg1: i32) -> (i32, i32) {
    %c1_i32 = arith.constant 1 : i32
    %0 = arith.muli %arg0, %c1_i32 : i32
    %1 = arith.addi %0, %arg1 : i32
    %c0_i32 = arith.constant 0 : i32
    %c0_i32_0 = arith.constant 0 : i32
    return %1, %c0_i32 : i32, i32
  }
  func.func @transform_2(%arg0: i32, %arg1: i32) -> (i32, i32) {
    %c1_i32 = arith.constant 1 : i32
    %0 = arith.muli %arg0, %c1_i32 : i32
    %1 = arith.addi %0, %arg1 : i32
    %c0_i32 = arith.constant 0 : i32
    %c0_i32_0 = arith.constant 0 : i32
    return %1, %c0_i32 : i32, i32
  }
  func.func @transform_3(%arg0: i32, %arg1: i32) -> (i32, i32) {
    %c0_i32 = arith.constant 0 : i32
    %c0_i32_0 = arith.constant 0 : i32
    return %arg0, %c0_i32 : i32, i32
  }
}

</mosaic_0001>

<bundles_post_ra>
// kernel: ldam_loss.1
= control target key start
LH: loop header
LB: loop body
LE: loop exit
PB: predicated region body
PF: predicated region fallthrough
CT: control target
= control target key end

     0   :  { %8 = vsyncpa [#allocation3], 0  ;;  %s509_s12 = smov 0   ;;  %s511_s13 = smov 0   ;;  %s564_s0 = inlined_call_operand.vmem [shape: f32[4], index: 0, kind: input, shape index: {}]   ;;  %s565_s1 = inlined_call_operand.vmem [shape: f32[32,128], index: 1, kind: input, shape index: {}]   ;;  %s566_s2 = inlined_call_operand.vmem [shape: f32[32,128], index: 2, kind: input, shape index: {}]   ;;  %s567_s3 = inlined_call_operand.vmem [shape: f32[16,128], index: 3, kind: output, shape index: {}]  }
   0x1   :  { %s513_s14 = smov 0  }
   0x2 LB: > { %s384_s15 = sadd.s32 4294967295, %s486_s14   ;;  %s26_s16 = sadd.s32 1, %s482_s13  ;;  %s486_s14 = sphi %s513_s14, %s14_s14   ;;  %s482_s13 = sphi %s511_s13, %s569_s13   ;;  %s478_s12 = sphi %s509_s12, %s568_s12  }
   0x3   : > { %p28_p0 = scmp.ge.s32.totalorder %s26_s16, 2  ;;  %p386_p1 = scmp.ge.s32.totalorder %s486_s14, 1 }
   0x4   : > { %p134_p2 = scmp.lt.s32.totalorder %s486_s14, 3  ;;  %p409_p4 = scmp.eq.s32.totalorder %s384_s15, 0 }
   0x5   : > { %s571_s16 = smov (%p28_p0, %s26_s16), 0  ;;  %s146_s19 = sshll.u32 %s564_s0, 4  ;;  %s147_s19 = int_to_ptr.vmem [resolvable:$true] %s146_s19 }
   0x6   : > { %p135_p3 = pnand %p386_p1, %p134_p2  ;;  %s488_s20 = smov [#allocation2]  }
   0x8   : > { %p405_p5 = pneg %p135_p3  ;;  %181 = sbr.rel (%p135_p3) target bundleno = 60 (0x3c), region = 32 }
   0xa   : > { %p406_p6 = pnand %p409_p4, %p405_p5 }
   0xc   : > { %408 = dma.vmem_to_smem (!%p406_p6), %s147_s19, 16, %s488_s20, [#allocation3]  }
   0xd   : > { %473 = dma.done.wait (%p409_p4), [#allocation3], 16  }
   0xe   : > { %475 = vsyncadd (%p409_p4), [#allocation3], 4294967280 }
   0xf   : > { %188 = sfence }
  0x10   : > { %s391_s21 = sshll.u32 %s478_s12, 1  ;;  %s238_s22 = sld [smem:[#allocation2]] }
  0x11   : > { %p215_p7 = scmp.lt.s32.totalorder %s391_s21, 3  ;;  %s396_s23 = sld [smem:[#allocation2 + $0x1]] }
  0x12   : > { %s542_s4 = sld [smem:[#allocation2 + $0x2]]  ;;  %p229_p8 = scmp.lt.s32.totalorder %s478_s12, 1 }
  0x13   : > { %s573_s21 = smov (!%p215_p7, %s391_s21), 3  ;;  %s544_s5 = sld [smem:[#allocation2 + $0x3]] }
  0x14   : > { %s392_s24 = sshll.u32 %s573_s21, 3  ;;  %s575_s12 = smov (!%p229_p8, %s478_s12), 1 }
  0x15   : > { %s218_s27 = scalar_lea.vmem %s565_s1, %s392_s24  ;;  %s226_s30 = scalar_lea.vmem %s566_s2, %s392_s24 }
  0x16   : > { %v242_v0 = vld [vmem:[%s226_s30] sm:$0xff]  ;;  %v243_v1 = vld [vmem:[%s226_s30 + $0x8] sm:$0xff]  ;;  %v249_v2 = vstv %s238_s22  ;;  %s395_s6 = sshll.u32 %s575_s12, 3 }
  0x17   : > { %vm244_vm0 = vcmp.eq.f32.partialorder %v242_v0, 1.0  ;;  %vm245_vm1 = vcmp.eq.f32.partialorder %v243_v1, 1.0  ;;  %v246_v3 = vld [vmem:[%s218_s27] sm:$0xff]  ;;  %v247_v4 = vld [vmem:[%s218_s27 + $0x8] sm:$0xff]  ;;  %v248_v5 = vstv %s396_s23  ;;  %s232_s9 = scalar_lea.vmem %s567_s3, %s395_s6 }
  0x18   : > { %v250_v6 = vsel %vm244_vm0, %v248_v5, %v249_v2  ;;  %v251_v7 = vsel %vm245_vm1, %v248_v5, %v249_v2  ;;  %v289_v31 = vstv %s542_s4 }
  0x19   : > { %v252_v8 = vsub.f32 %v246_v3, %v250_v6  ;;  %v253_v9 = vsub.f32 %v247_v4, %v251_v7  ;;  %v288_v35 = vstv %s544_s5 }
  0x1a   : > { %v290_v41 = vsel %vm244_vm0, %v288_v35, %v289_v31  ;;  %v291_v44 = vsel %vm245_vm1, %v288_v35, %v289_v31 }
  0x1b   : > { %v260_v10 = vand.u32 2147483647, %v252_v8  ;;  %v261_v11 = vand.u32 2147483647, %v253_v9  ;;  %v254_v23 = vmax.f32 %v252_v8, 0.0  ;;  %v256_v24 = vmul.f32 %v252_v8, %v242_v0 }
  0x1c   : > { %v255_v27 = vmax.f32 %v253_v9, 0.0  ;;  %v257_v28 = vmul.f32 %v253_v9, %v243_v1 }
  0x1d   : > { %v262_v12 = vsub.f32 0.0, %v260_v10  ;;  %v263_v13 = vsub.f32 0.0, %v261_v11  ;;  %v258_v33 = vsub.f32 %v254_v23, %v256_v24 }
  0x1e   : > { %v259_v37 = vsub.f32 %v255_v27, %v257_v28 }
  0x1f   : > { %v264_v14 = vmul.f32 1.442695, %v262_v12  ;;  %v266_v15 = vmul.f32 1.442695, %v263_v13 }
  0x21   : > { %437 = vpow2.f32 %v264_v14 }
  0x22   : > { %439 = vpow2.f32 %v266_v15 }
  0x27   : > { %v438_v16 = vpop.eup %437 }
  0x28   : > { %v440_v17 = vpop.eup %439  ;;  %v268_v18 = vadd.f32 1.0, %v438_v16  ;;  %v271_v19 = vmul.f32 -0.5, %v438_v16  ;;  %v274_v25 = vand.u32 2147483647, %v438_v16 }
  0x29   : > { %v277_v20 = vadd.f32 1.0, %v440_v17  ;;  %v280_v21 = vmul.f32 -0.5, %v440_v17  ;;  %v283_v29 = vand.u32 2147483647, %v440_v17 }
  0x2a   : > { %441 = vlog2.f32 %v268_v18  ;;  %v272_v22 = vadd.f32 1.0, %v271_v19  ;;  %vm275_vm2 = vcmp.lt.f32.partialorder %v274_v25, 0.0004427343 }
  0x2b   : > { %443 = vlog2.f32 %v277_v20  ;;  %v281_v26 = vadd.f32 1.0, %v280_v21  ;;  %vm284_vm3 = vcmp.lt.f32.partialorder %v283_v29, 0.0004427343 }
  0x2c   : > { %v273_v30 = vmul.f32 %v438_v16, %v272_v22 }
  0x2d   : > { %v282_v34 = vmul.f32 %v440_v17, %v281_v26 }
  0x30   : > { %v442_v32 = vpop.eup %441 }
  0x31   : > { %v444_v36 = vpop.eup %443  ;;  %v270_v38 = vmul.f32 0.6931472, %v442_v32 }
  0x32   : > { %v279_v39 = vmul.f32 0.6931472, %v444_v36 }
  0x33   : > { %v276_v40 = vsel %vm275_vm2, %v273_v30, %v270_v38 }
  0x34   : > { %v285_v42 = vsel %vm284_vm3, %v282_v34, %v279_v39  ;;  %v286_v43 = vadd.f32 %v276_v40, %v258_v33 }
  0x35   : > { %v287_v45 = vadd.f32 %v285_v42, %v259_v37 }
  0x36   : > { %v292_v46 = vmul.f32 %v290_v41, %v286_v43 }
  0x37   : > { %v293_v47 = vmul.f32 %v291_v44, %v287_v45 }
  0x39   : > { %v295_v48 = vadd.f32 %v293_v47, %v292_v46 }
  0x3b   : > { %297 = vst [vmem:[%s232_s9] sm:$0xff] %v295_v48 }
  0x3c PF: > { %s14_s14 = sadd.s32 1, %s486_s14   ;;  %s568_s12 = smov %s482_s13 }
  0x3d   : > { %p11_p9 = scmp.ge.s32.totalorder %s14_s14, 4   ;;  %s569_s13 = smov %s571_s16 }
  0x3f   :  { %13 = sbr.rel (!%p11_p9) target bundleno = 2 (0x2), region = 74 }
  0x44   :  { %317 = vsyncpa [#allocation3], 1 }
  0x45   :  { %319 = vsyncpa [#allocation3 + $0x1], 1 }

</bundles_post_ra>
